<compile_context>
chip_gen: v7x
topology: tpu7x:2x2x1
jax: 0.10.0
libtpu: 0.0.40
codegen_flags: <defaults>
</compile_context>

<pallas_src>
import jax
import jax.numpy as jnp
from jax.experimental import pallas as pl
from jax.experimental.pallas import tpu as pltpu


def _cdiv(a, b):
    return -(-a // b)


def _tpu_topology():
    """(tensorcores per device, physical VMEM bytes) — defensive, with fallbacks."""
    vmem_cap = 64 * 1024 * 1024          # conservative default (v7x floor)
    cores = 1
    try:
        info = pltpu.get_tpu_info()
        vmem_cap = int(getattr(info, "vmem_capacity_bytes", vmem_cap))
    except Exception:
        pass
    try:
        kind = jax.devices()[0].device_kind.lower()
        if "v7" in kind:                 # 2 TensorCores per chip on v7x
            cores = 2
    except Exception:
        pass
    return cores, vmem_cap


def _ce_kernel(logits_ref, labels_ref, wrow_ref, out_ref, acc_nll_ref, acc_w_ref):
    """Weighted cross entropy over one row tile; partial (num, den) per core."""
    i = pl.program_id(1)

    @pl.when(i == 0)
    def _init():
        acc_nll_ref[...] = jnp.zeros_like(acc_nll_ref)
        acc_w_ref[...] = jnp.zeros_like(acc_w_ref)

    x = logits_ref[...]                                   # (T, C), native dtype
    labels = labels_ref[...]                              # (T, 1) int32
    w_row = wrow_ref[...]                                  # (T, 1) f32 (0 => ignored row)

    # target mask via iota-compare (no gather); out-of-range labels match no column.
    col = jax.lax.broadcasted_iota(jnp.int32, x.shape, 1)  # (T, C)
    is_tgt = col == labels                                  # (T, C) bool

    # single shifted pass: rowmax/compare in native dtype, one f32 materialization.
    m = jnp.max(x, axis=-1, keepdims=True)                  # (T, 1)
    shifted = (x - m).astype(jnp.float32)                   # (T, C) f32

    picked_shifted = jnp.sum(jnp.where(is_tgt, shifted, 0.0), axis=-1, keepdims=True)
    denom = jnp.sum(jnp.exp(shifted), axis=-1, keepdims=True)

    # per-row accumulation only (VPU adds); full reduce deferred to the epilogue.
    acc_nll_ref[...] += w_row * (jnp.log(denom) - picked_shifted)
    acc_w_ref[...] += w_row

    @pl.when(i == pl.num_programs(1) - 1)
    def _finalize():
        num = jnp.sum(acc_nll_ref[...])
        den = jnp.sum(acc_w_ref[...])
        # sublane 0 of this core's (8,128) output block = numerator, rest = denominator
        sub = jax.lax.broadcasted_iota(jnp.int32, out_ref.shape, 1)
        out_ref[...] = jnp.where(sub == 0, num, den)


def cross_entropy_loss(logits, labels, weight, *, tile_n=512, n_split=None):
    """logits: (N, C) float, labels: (N,) int, weight: (C,) float -> scalar f32."""
    N, C = logits.shape
    itemsize = jnp.dtype(logits.dtype).itemsize
    sub_mult = {4: 8, 2: 16, 1: 32}.get(itemsize, 8)       # sublane tiling multiple

    n_cores, vmem_cap = _tpu_topology()
    if n_split is None:
        n_split = n_cores                                   # 1 on v5e/v6e, 2 on v7x

    # Per-row VMEM footprint: double-buffered input tile + ~4x f32 temporaries
    # (shifted, exp, select, mask) + lane-padded (t,1) label/weight/acc buffers.
    per_row_bytes = 2 * C * itemsize + 4 * C * 4 + 3072
    # Working budget: larger on 128 MiB parts (v5e/v6e), tighter on v7x (64 MiB).
    budget = (24 if vmem_cap >= 100 * 1024 * 1024 else 12) * 1024 * 1024
    cap = max(sub_mult, (budget // per_row_bytes) // sub_mult * sub_mult)

    rows_per_split = _cdiv(N, n_split)
    t = min(tile_n, cap, _cdiv(rows_per_split, sub_mult) * sub_mult)
    t = max(sub_mult, (t // sub_mult) * sub_mult)
    steps = _cdiv(rows_per_split, t)
    n_pad = n_split * steps * t
    pad = n_pad - N

    weight_f = weight.astype(jnp.float32)
    labels_i = labels.astype(jnp.int32)
    # Per-row class weight in the wrapper (O(N) gather). Out-of-range labels
    # (torch ignore_index style) and padding rows get weight 0 -> excluded.
    valid = (labels_i >= 0) & (labels_i < C)
    w_rows = jnp.where(valid, weight_f[jnp.clip(labels_i, 0, C - 1)], 0.0)

    logits_p = jnp.pad(logits, ((0, pad), (0, 0))) if pad else logits
    labels_p = jnp.pad(labels_i, ((0, pad),), constant_values=C) if pad else labels_i
    w_rows_p = jnp.pad(w_rows, ((0, pad),)) if pad else w_rows
    labels2d = labels_p.reshape(n_pad, 1)
    w_rows2d = w_rows_p.reshape(n_pad, 1)

    # Explicit scoped-VMEM limit: honest about in-kernel temporaries, capped
    # well inside physical VMEM on every generation.
    vmem_limit = int(min(vmem_cap * 3 // 4, max(32 * 1024 * 1024, 2 * budget)))

    grid = (n_split, steps)

    partial = pl.pallas_call(
        _ce_kernel,
        out_shape=jax.ShapeDtypeStruct((n_split, 8, 128), jnp.float32),
        grid_spec=pltpu.PrefetchScalarGridSpec(
            num_scalar_prefetch=0,
            grid=grid,
            in_specs=[
                pl.BlockSpec((t, C), lambda c, i: (c * steps + i, 0)),   # logits tile
                pl.BlockSpec((t, 1), lambda c, i: (c * steps + i, 0)),   # labels tile
                pl.BlockSpec((t, 1), lambda c, i: (c * steps + i, 0)),   # per-row weights
            ],
            out_specs=pl.BlockSpec((1, 8, 128), lambda c, i: (c, 0, 0)),  # per-core (num, den)
            scratch_shapes=[
                pltpu.VMEM((t, 1), jnp.float32),   # per-row weighted NLL accumulator
                pltpu.VMEM((t, 1), jnp.float32),   # per-row weight accumulator
            ],
        ),
        compiler_params=pltpu.CompilerParams(
            dimension_semantics=("parallel", "arbitrary"),
            vmem_limit_bytes=vmem_limit,
        ),
    )(logits_p, labels2d, w_rows2d)

    num = jnp.sum(partial[:, 0, 0])
    den = jnp.sum(partial[:, 1, 0])
    # den == 0 (all-zero weights in the batch) yields inf/nan, matching torch.
    return num / den


def _reference_ce(logits, labels, weight):
    """Pure-JAX reference matching torch.nn.CrossEntropyLoss(weight=...)."""
    logits = logits.astype(jnp.float32)
    lse = jax.scipy.special.logsumexp(logits, axis=-1)
    picked = jnp.take_along_axis(logits, labels[:, None].astype(jnp.int32), axis=-1)[:, 0]
    w_i = weight[labels]
    return jnp.sum(w_i * (lse - picked)) / jnp.sum(w_i)


if __name__ == "__main__":
    key = jax.random.PRNGKey(0)
    N, C = 16, 32  # batch rows, number of classes

    k1, k2, k3 = jax.random.split(key, 3)
    logits = jax.random.normal(k1, (N, C), dtype=jnp.float32)
    labels = jax.random.randint(k2, (N,), 0, C, dtype=jnp.int32)
    # deterministic class weights (as would be passed to __init__)
    weight = 0.5 + 0.05 * jnp.arange(C, dtype=jnp.float32)

    loss = jax.block_until_ready(cross_entropy_loss(logits, labels, weight))
    ref = _reference_ce(logits, labels, weight)
    assert jnp.allclose(loss, ref, rtol=1e-5, atol=1e-5), (loss, ref)

    # exercise the padding / non-divisible-batch path
    N2 = 13
    logits2 = jax.random.normal(k3, (N2, C), dtype=jnp.float32)
    labels2 = labels[:N2]
    loss2 = jax.block_until_ready(cross_entropy_loss(logits2, labels2, weight))
    ref2 = _reference_ce(logits2, labels2, weight)
    assert jnp.allclose(loss2, ref2, rtol=1e-5, atol=1e-5), (loss2, ref2)

    print("KERNEL_OK")
</pallas_src>

<mosaic_0001>
module attributes {stable_mosaic.version = 11 : i64} {
  func.func @_ce_kernel(%arg0: i32, %arg1: i32, %arg2: memref<16x32xf32, #tpu.memory_space<vmem>>, %arg3: memref<16x1xi32, #tpu.memory_space<vmem>>, %arg4: memref<16x1xf32, #tpu.memory_space<vmem>>, %arg5: memref<1x8x128xf32, #tpu.memory_space<vmem>>, %arg6: memref<16x1xf32, #tpu.memory_space<vmem>>, %arg7: memref<16x1xf32, #tpu.memory_space<vmem>>) attributes {dimension_semantics = [#tpu.dimension_semantics<parallel>, #tpu.dimension_semantics<arbitrary>], iteration_bounds = array<i64: 1, 1>, scalar_prefetch = 0 : i64, scratch_operands = 2 : i64, tpu.core_type = #tpu.core_type<tc>, window_params = [{transform_indices = @transform_0, window_bounds = array<i64: 16, 32>}, {transform_indices = @transform_1, window_bounds = array<i64: 16, 1>}, {transform_indices = @transform_2, window_bounds = array<i64: 16, 1>}, {transform_indices = @transform_3, window_bounds = array<i64: 1, 8, 128>}]} {
    %c0_i32 = arith.constant 0 : i32
    %0 = arith.cmpi eq, %arg1, %c0_i32 : i32
    %1 = arith.extui %0 : i1 to i32
    %c0_i32_0 = arith.constant 0 : i32
    %2 = arith.cmpi ne, %1, %c0_i32_0 : i32
    scf.if %2 {
      %cst_19 = arith.constant 0.000000e+00 : f32
      %32 = vector.broadcast %cst_19 : f32 to vector<16x1xf32>
      %c0_20 = arith.constant 0 : index
      %c0_21 = arith.constant 0 : index
      %33 = vector.load %arg6[%c0_20, %c0_21] : memref<16x1xf32, #tpu.memory_space<vmem>>, vector<16x1xf32>
      tpu.vector_store %arg6[%c0_20, %c0_21], %32 {strides = array<i32>} : memref<16x1xf32, #tpu.memory_space<vmem>>, vector<16x1xf32>,
      %cst_22 = arith.constant 0.000000e+00 : f32
      %34 = vector.broadcast %cst_22 : f32 to vector<16x1xf32>
      %c0_23 = arith.constant 0 : index
      %c0_24 = arith.constant 0 : index
      %35 = vector.load %arg7[%c0_23, %c0_24] : memref<16x1xf32, #tpu.memory_space<vmem>>, vector<16x1xf32>
      tpu.vector_store %arg7[%c0_23, %c0_24], %34 {strides = array<i32>} : memref<16x1xf32, #tpu.memory_space<vmem>>, vector<16x1xf32>,
    } else {
    }
    %c0 = arith.constant 0 : index
    %c0_1 = arith.constant 0 : index
    %3 = vector.load %arg2[%c0, %c0_1] : memref<16x32xf32, #tpu.memory_space<vmem>>, vector<16x32xf32>
    %c0_2 = arith.constant 0 : index
    %c0_3 = arith.constant 0 : index
    %4 = vector.load %arg3[%c0_2, %c0_3] : memref<16x1xi32, #tpu.memory_space<vmem>>, vector<16x1xi32>
    %c0_4 = arith.constant 0 : index
    %c0_5 = arith.constant 0 : index
    %5 = vector.load %arg4[%c0_4, %c0_5] : memref<16x1xf32, #tpu.memory_space<vmem>>, vector<16x1xf32>
    %6 = tpu.iota {dimensions = array<i32: 1>} : vector<16x32xi32>
    %7 = vector.broadcast %4 : vector<16x1xi32> to vector<16x32xi32>
    %8 = arith.cmpi eq, %6, %7 : vector<16x32xi32>
    %cst = arith.constant dense<0xFF800000> : vector<16xf32>
    %9 = vector.multi_reduction <maximumf>, %3, %cst [1] : vector<16x32xf32> to vector<16xf32>
    %10 = vector.shape_cast %9 : vector<16xf32> to vector<16x1xf32>
    %11 = vector.broadcast %10 : vector<16x1xf32> to vector<16x32xf32>
    %12 = arith.subf %3, %11 : vector<16x32xf32>
    %cst_6 = arith.constant 0.000000e+00 : f32
    %13 = vector.broadcast %cst_6 : f32 to vector<16x32xf32>
    %14 = arith.select %8, %12, %13 : vector<16x32xi1>, vector<16x32xf32>
    %cst_7 = arith.constant dense<0.000000e+00> : vector<16xf32>
    %15 = vector.multi_reduction <add>, %14, %cst_7 [1] : vector<16x32xf32> to vector<16xf32>
    %16 = vector.shape_cast %15 : vector<16xf32> to vector<16x1xf32>
    %17 = math.exp %12 : vector<16x32xf32>
    %cst_8 = arith.constant dense<0.000000e+00> : vector<16xf32>
    %18 = vector.multi_reduction <add>, %17, %cst_8 [1] : vector<16x32xf32> to vector<16xf32>
    %19 = vector.shape_cast %18 : vector<16xf32> to vector<16x1xf32>
    %c0_9 = arith.constant 0 : index
    %c0_10 = arith.constant 0 : index
    %20 = vector.load %arg6[%c0_9, %c0_10] : memref<16x1xf32, #tpu.memory_space<vmem>>, vector<16x1xf32>
    %21 = math.log %19 : vector<16x1xf32>
    %22 = arith.subf %21, %16 : vector<16x1xf32>
    %23 = arith.mulf %5, %22 : vector<16x1xf32>
    %24 = arith.addf %20, %23 : vector<16x1xf32>
    %c0_11 = arith.constant 0 : index
    %c0_12 = arith.constant 0 : index
    %25 = vector.load %arg6[%c0_11, %c0_12] : memref<16x1xf32, #tpu.memory_space<vmem>>, vector<16x1xf32>
    tpu.vector_store %arg6[%c0_11, %c0_12], %24 {strides = array<i32>} : memref<16x1xf32, #tpu.memory_space<vmem>>, vector<16x1xf32>,
    %c0_13 = arith.constant 0 : index
    %c0_14 = arith.constant 0 : index
    %26 = vector.load %arg7[%c0_13, %c0_14] : memref<16x1xf32, #tpu.memory_space<vmem>>, vector<16x1xf32>
    %27 = arith.addf %26, %5 : vector<16x1xf32>
    %c0_15 = arith.constant 0 : index
    %c0_16 = arith.constant 0 : index
    %28 = vector.load %arg7[%c0_15, %c0_16] : memref<16x1xf32, #tpu.memory_space<vmem>>, vector<16x1xf32>
    tpu.vector_store %arg7[%c0_15, %c0_16], %27 {strides = array<i32>} : memref<16x1xf32, #tpu.memory_space<vmem>>, vector<16x1xf32>,
    %c0_i32_17 = arith.constant 0 : i32
    %29 = arith.cmpi eq, %arg1, %c0_i32_17 : i32
    %30 = arith.extui %29 : i1 to i32
    %c0_i32_18 = arith.constant 0 : i32
    %31 = arith.cmpi ne, %30, %c0_i32_18 : i32
    scf.if %31 {
      %c0_19 = arith.constant 0 : index
      %c0_20 = arith.constant 0 : index
      %32 = vector.load %arg6[%c0_19, %c0_20] : memref<16x1xf32, #tpu.memory_space<vmem>>, vector<16x1xf32>
      %33 = vector.shape_cast %32 : vector<16x1xf32> to vector<1x16x1xf32>
      %cst_21 = arith.constant dense<0.000000e+00> : vector<1xf32>
      %34 = vector.multi_reduction <add>, %33, %cst_21 [1, 2] : vector<1x16x1xf32> to vector<1xf32>
      %35 = vector.shape_cast %34 : vector<1xf32> to vector<1x1x1xf32>
      %36 = vector.extract %35[0, 0, 0] : f32 from vector<1x1x1xf32>
      %c0_22 = arith.constant 0 : index
      %c0_23 = arith.constant 0 : index
      %37 = vector.load %arg7[%c0_22, %c0_23] : memref<16x1xf32, #tpu.memory_space<vmem>>, vector<16x1xf32>
      %38 = vector.shape_cast %37 : vector<16x1xf32> to vector<1x16x1xf32>
      %cst_24 = arith.constant dense<0.000000e+00> : vector<1xf32>
      %39 = vector.multi_reduction <add>, %38, %cst_24 [1, 2] : vector<1x16x1xf32> to vector<1xf32>
      %40 = vector.shape_cast %39 : vector<1xf32> to vector<1x1x1xf32>
      %41 = vector.extract %40[0, 0, 0] : f32 from vector<1x1x1xf32>
      %42 = tpu.iota {dimensions = array<i32: 1>} : vector<1x8x128xi32>
      %c0_i32_25 = arith.constant 0 : i32
      %43 = vector.broadcast %c0_i32_25 : i32 to vector<1x8x128xi32>
      %44 = arith.cmpi eq, %42, %43 : vector<1x8x128xi32>
      %45 = vector.broadcast %36 : f32 to vector<1x8x128xf32>
      %46 = vector.broadcast %41 : f32 to vector<1x8x128xf32>
      %47 = arith.select %44, %45, %46 : vector<1x8x128xi1>, vector<1x8x128xf32>
      %c0_26 = arith.constant 0 : index
      %c0_27 = arith.constant 0 : index
      %c0_28 = arith.constant 0 : index
      %48 = vector.load %arg5[%c0_26, %c0_27, %c0_28] : memref<1x8x128xf32, #tpu.memory_space<vmem>>, vector<1x8x128xf32>
      tpu.vector_store %arg5[%c0_26, %c0_27, %c0_28], %47 {strides = array<i32>} : memref<1x8x128xf32, #tpu.memory_space<vmem>>, vector<1x8x128xf32>,
    } else {
    }
    return
  }
  func.func @transform_0(%arg0: i32, %arg1: i32) -> (i32, i32) {
    %c1_i32 = arith.constant 1 : i32
    %0 = arith.muli %arg0, %c1_i32 : i32
    %1 = arith.addi %0, %arg1 : i32
    %c0_i32 = arith.constant 0 : i32
    %c0_i32_0 = arith.constant 0 : i32
    return %1, %c0_i32 : i32, i32
  }
  func.func @transform_1(%arg0: i32, %arg1: i32) -> (i32, i32) {
    %c1_i32 = arith.constant 1 : i32
    %0 = arith.muli %arg0, %c1_i32 : i32
    %1 = arith.addi %0, %arg1 : i32
    %c0_i32 = arith.constant 0 : i32
    %c0_i32_0 = arith.constant 0 : i32
    return %1, %c0_i32 : i32, i32
  }
  func.func @transform_2(%arg0: i32, %arg1: i32) -> (i32, i32) {
    %c1_i32 = arith.constant 1 : i32
    %0 = arith.muli %arg0, %c1_i32 : i32
    %1 = arith.addi %0, %arg1 : i32
    %c0_i32 = arith.constant 0 : i32
    %c0_i32_0 = arith.constant 0 : i32
    return %1, %c0_i32 : i32, i32
  }
  func.func @transform_3(%arg0: i32, %arg1: i32) -> (i32, i32, i32) {
    %c0_i32 = arith.constant 0 : i32
    %c0_i32_0 = arith.constant 0 : i32
    %c0_i32_1 = arith.constant 0 : i32
    return %arg0, %c0_i32, %c0_i32_0 : i32, i32, i32
  }
}

</mosaic_0001>

<bundles_post_ra>
// kernel: tpu_custom_call.1
= control target key start
LH: loop header
LB: loop body
LE: loop exit
PB: predicated region body
PF: predicated region fallthrough
CT: control target
= control target key end

     0   :  { %vm106_vm0 = vcmask 261120   ;;  %v265_v4 = vmov 0   ;;  %s338_s0 = inlined_call_operand.vmem [shape: f32[16,32], index: 0, kind: input, shape index: {}]   ;;  %s339_s1 = inlined_call_operand.vmem [shape: s32[16,1], index: 1, kind: input, shape index: {}]   ;;  %s340_s2 = inlined_call_operand.vmem [shape: f32[16,1], index: 2, kind: input, shape index: {}]   ;;  %s341_s3 = inlined_call_operand.hbm [shape: f32[1,8,128], index: 3, kind: output, shape index: {}]  }
   0x1   :  { %v90_v0 = vld [vmem:[%s338_s0] sm:$0xff]  ;;  %v91_v1 = vld [vmem:[%s338_s0 + $0x8] sm:$0xff]  ;;  %231 = vset.pattern.permute.xlu1 %v265_v4  ;;  %232 = vset.pattern.permute.xlu0 %v265_v4 }
   0x2   :  { %v92_v2 = vld [vmem:[%s339_s1] sm:$0xff]  ;;  %v107_v3 = vsel %vm106_vm0, %v90_v0, -inf }
   0x3   :  { %8 = vsyncpa [#allocation5], 0  ;;  %108 = vmax.xlane.f32.xlu0 %v107_v3  ;;  %99 = vperm.xlu1 %231, %v92_v2   ;;  %v110_v5 = vsel %vm106_vm0, %v91_v1, -inf  ;;  %v93_v6 = vld [vmem:[%s339_s1 + $0x8] sm:$0xff]  ;;  %v96_v12 = vlaneseq  ;;  %vm85_vm3 = vcmask 7168   ;;  %v266_v25 = vmov 0.0  }
   0x4   :  { %86 = vst.msk [vmem:[#allocation2] sm:$0xff] %vm85_vm3, %v266_v25  ;;  %88 = vst.msk [vmem:[#allocation3] sm:$0xff] %vm85_vm3, %v266_v25  ;;  %v94_v26 = vld [vmem:[%s340_s2] sm:$0xff]  ;;  %v95_v29 = vld [vmem:[%s340_s2 + $0x8] sm:$0xff]  ;;  %s267_s22 = smov [#allocation4]  }
   0x5   :  { %v97_v15 = vand.u32 127, %v96_v12  ;;  %87 = vst.msk [vmem:[#allocation2 + $0x8] sm:$0xff] %vm85_vm3, %v266_v25  ;;  %89 = vst.msk [vmem:[#allocation3 + $0x8] sm:$0xff] %vm85_vm3, %v266_v25  ;;  %s198_s23 = sshll.u32 %s267_s22, 4  ;;  %s199_s23 = int_to_ptr.vmem [resolvable:$true] %s198_s23 }
   0x6   :  { %s241_s25 = scalar_lea.vmem %s199_s23, 128  ;;  %p246_p1 = scmp.lt.s32.totalorder %s199_s23, %s199_s23 }
   0x7   :  { %111 = vmax.xlane.f32.xlu0 %v110_v5  ;;  %102 = vperm.xlu1 %231, %v93_v6   ;;  %p242_p0 = scmp.ne.s32.totalorder %s199_s23, %s241_s25  ;;  %p247_p2 = scmp.lt.s32.totalorder %s241_s25, %s241_s25 }
   0x9   :  { %p248_p3 = por %p247_p2, %p246_p1 }
   0xb   :  { %v148_v27 = vld [vmem:[#allocation3] sm:$0xff]  ;;  %v133_v39 = vld [vmem:[#allocation2] sm:$0xff]  ;;  %p249_p4 = pnand %p248_p3, %p242_p0 }
   0xc   :  { %v150_v28 = vadd.f32 %v148_v27, %v94_v26  ;;  %v149_v30 = vld [vmem:[#allocation3 + $0x8] sm:$0xff]  ;;  %v134_v45 = vld [vmem:[#allocation2 + $0x8] sm:$0xff] }
   0xd   :  { %v151_v31 = vadd.f32 %v149_v30, %v95_v29 }
   0xe   :  { %152 = vst.msk [vmem:[#allocation3] sm:$0xff] %vm85_vm3, %v150_v28 }
   0xf   :  { %153 = vst.msk [vmem:[#allocation3 + $0x8] sm:$0xff] %vm85_vm3, %v151_v31 }
  0x15   :  { %v171_v49 = vld [vmem:[#allocation3] sm:$0xff] }
  0x16   :  { %v172_v50 = vld [vmem:[#allocation3 + $0x8] sm:$0xff]  ;;  %v173_v54 = vsel %vm85_vm3, %v171_v49, 0.0 }
  0x17   :  { %v174_v55 = vsel %vm85_vm3, %v172_v50, 0.0 }
  0x18   :  { %v175_v57 = vadd.f32 %v174_v55, %v173_v54 }
  0x82   :  { %v100_v14 = vpop.permute.xlu1 %99 }
  0x83   :  { %vm104_vm1 = vcmp.eq.s32.totalorder %v97_v15, %v100_v14 }
  0x86   :  { %v103_v17 = vpop.permute.xlu1 %102 }
  0x87   :  { %vm105_vm2 = vcmp.eq.s32.totalorder %v97_v15, %v103_v17 }
  0x90   :  { %v109_v7 = vpop.xlane.xlu0 %108 }
  0x91   :  { %v113_v8 = vsub.f32 %v90_v0, %v109_v7 }
  0x93   :  { %v123_v9 = vmul.f32 1.442695, %v113_v8  ;;  %v115_v19 = vsel %vm104_vm1, %v113_v8, 0.0  ;;  %v186_v8 = vshrl.u32 %v96_v12, 7 }
  0x94   :  { %v112_v10 = vpop.xlane.xlu0 %111  ;;  %v117_v21 = vsel %vm106_vm0, %v115_v19, 0.0 }
  0x95   :  { %233 = vpow2.f32 %v123_v9  ;;  %v114_v11 = vsub.f32 %v91_v1, %v112_v10  ;;  %vm187_vm4 = vcmp.eq.s32.totalorder %v186_v8, 0 }
  0x97   :  { %v125_v13 = vmul.f32 1.442695, %v114_v11  ;;  %v116_v23 = vsel %vm105_vm2, %v114_v11, 0.0 }
  0x98   :  { %v120_v24 = vsel %vm106_vm0, %v116_v23, 0.0 }
  0x99   :  { %235 = vpow2.f32 %v125_v13 }
  0x9f   :  { %v234_v16 = vpop.eup %233 }
  0xa0   :  { %v127_v18 = vsel %vm106_vm0, %v234_v16, 0.0 }
  0xa1   :  { %128 = vadd.xlane.f32.xlu0 %v127_v18 }
  0xa3   :  { %v236_v20 = vpop.eup %235 }
  0xa4   :  { %v130_v22 = vsel %vm106_vm0, %v236_v20, 0.0 }
  0xa5   :  { %118 = vadd.xlane.f32.xlu0 %v117_v21  ;;  %131 = vadd.xlane.f32.xlu1 %v130_v22 }
  0xa9   :  { %121 = vadd.xlane.f32.xlu0 %v120_v24 }
 0x12e   :  { %v129_v32 = vpop.xlane.xlu0 %128 }
 0x12f   :  { %237 = vlog2.f32 %v129_v32 }
 0x132   :  { %v132_v33 = vpop.xlane.xlu1 %131  ;;  %v119_v35 = vpop.xlane.xlu0 %118 }
 0x133   :  { %239 = vlog2.f32 %v132_v33 }
 0x136   :  { %v122_v42 = vpop.xlane.xlu0 %121 }
 0x139   :  { %v238_v34 = vpop.eup %237 }
 0x13a   :  { %v136_v36 = vmul.f32 0.6931472, %v238_v34 }
 0x13c   :  { %v139_v37 = vsub.f32 %v136_v36, %v119_v35 }
 0x13d   :  { %v240_v38 = vpop.eup %239 }
 0x13e   :  { %v141_v40 = vmul.f32 %v139_v37, %v94_v26  ;;  %v138_v41 = vmul.f32 0.6931472, %v240_v38 }
 0x140   :  { %v143_v43 = vadd.f32 %v141_v40, %v133_v39  ;;  %v140_v44 = vsub.f32 %v138_v41, %v122_v42 }
 0x142   :  { %146 = vst.msk [vmem:[#allocation2] sm:$0xff] %vm85_vm3, %v143_v43  ;;  %v142_v46 = vmul.f32 %v140_v44, %v95_v29 }
 0x144   :  { %v144_v47 = vadd.f32 %v142_v46, %v134_v45 }
 0x146   :  { %147 = vst.msk [vmem:[#allocation2 + $0x8] sm:$0xff] %vm85_vm3, %v144_v47 }
 0x149   :  { %v157_v48 = vld [vmem:[#allocation2] sm:$0xff] }
 0x14a   :  { %v159_v52 = vsel %vm85_vm3, %v157_v48, 0.0 }
 0x14d   :  { %v158_v51 = vld [vmem:[#allocation2 + $0x8] sm:$0xff] }
 0x14e   :  { %v160_v53 = vsel %vm85_vm3, %v158_v51, 0.0 }
 0x14f   :  { %v161_v56 = vadd.f32 %v160_v53, %v159_v52 }
 0x151   :  { %162 = vadd.xlane.f32.xlu0 %v161_v56 }
 0x155   :  { %176 = vadd.xlane.f32.xlu0 %v175_v57 }
 0x1de   :  { %v163_v58 = vpop.xlane.xlu0 %162 }
 0x1df   :  { %v164_v59 = vrot.slane %v163_v58, 4 }
 0x1e1   :  { %v165_v60 = vadd.f32 %v164_v59, %v163_v58 }
 0x1e2   :  { %v177_v61 = vpop.xlane.xlu0 %176 }
 0x1e3   :  { %v166_v62 = vrot.slane %v165_v60, 2  ;;  %v178_v63 = vrot.slane %v177_v61, 4 }
 0x1e5   :  { %v179_v0 = vadd.f32 %v178_v63, %v177_v61  ;;  %v167_v1 = vadd.f32 %v166_v62, %v165_v60 }
 0x1e7   :  { %v180_v2 = vrot.slane %v179_v0, 2  ;;  %v168_v3 = vrot.slane %v167_v1, 1 }
 0x1e9   :  { %v181_v4 = vadd.f32 %v180_v2, %v179_v0  ;;  %v169_v5 = vadd.f32 %v168_v3, %v167_v1 }
 0x1eb   :  { %224 = vpush %v169_v5  ;;  %v182_v6 = vrot.slane %v181_v4, 1 }
 0x1ed   :  { %v183_v7 = vadd.f32 %v182_v6, %v181_v4 }
 0x1ef   :  { %226 = vpush %v183_v7 }
 0x21c   :  { %s225_s2 = spop %224 }
 0x21d   :  { %v188_v9 = vstv %s225_s2 }
 0x220   :  { %s227_s24 = spop %226 }
 0x221   :  { %v189_v10 = vstv %s227_s24 }
 0x222   :  { %v190_v11 = vsel %vm187_vm4, %v188_v9, %v189_v10 }
 0x223   :  { %191 = vst [vmem:[#allocation4] sm:$0xff] %v190_v11 }
 0x224   :  { %252 = shalt.err (!%p249_p4)
}
 0x225   :  { %s253_s28 = scalar_lea.hbm %s341_s3, 128 }
 0x226   :  { %p254_p5 = scmp.ne.s32.totalorder %s341_s3, %s253_s28  ;;  %p257_p6 = scmp.lt.u32.totalorder %s253_s28, %s341_s3 }
 0x228   :  { %p259_p7 = pnand %p257_p6, %p254_p5 }
 0x22a   :  { %262 = shalt.err (!%p259_p7)
}
 0x22b   :  { %201 = dma.vmem_to_hbm [thread:$0]  %s199_s23, 128, %s341_s3, [#allocation5]  }
 0x22c   :  { %263 = dma.done.wait [#allocation5], 128  }
 0x22d   :  { %264 = vsyncadd [#allocation5], 4294967168 }
 0x22e   :  { %205 = vsyncpa [#allocation5], 1 }

</bundles_post_ra>
